<compile_context>
chip_gen: v5e
topology: v5e:2x2
jax: 0.10.0
libtpu: 0.0.40
codegen_flags: <defaults>
</compile_context>

<pallas_src>
import jax
import jax.numpy as jnp
from jax.experimental import pallas as pl
from jax.experimental.pallas import tpu as pltpu


# ---------------- fused Pallas kernel (one batch block per grid step) ----------------

def policy_block_kernel(x_ref, wbig_ref, bconv_ref, wlt_ref, blin_ref, o_ref):
    """Fused 1x1 conv + LeakyReLU + CHW flatten + Linear for a block of batch rows.

    x_ref    : (Bblk, Cin*S)      flattened NCHW input rows (lane axis = Cin*S)
    wbig_ref : (Cin*S, Cout*S)    block-diagonal expanded conv weight
    bconv_ref: (1, Cout*S)        conv bias broadcast over spatial positions
    wlt_ref  : (Cout*S, A)        linear weight, transposed (CHW-flatten row order)
    blin_ref : (1, A)             linear bias
    o_ref    : (Bblk, A)          output block
    """
    # 1x1 conv as a single lane-dense matmul; result is already in PyTorch's
    # CHW-flatten order along the lane axis.
    h = jnp.dot(x_ref[...], wbig_ref[...], preferred_element_type=jnp.float32)
    h = h + bconv_ref[...]
    h = jnp.maximum(h, 0.01 * h)          # LeakyReLU, PyTorch default slope 0.01

    # Linear: one more matmul over the flattened activation.
    out = jnp.dot(h, wlt_ref[...], preferred_element_type=jnp.float32) + blin_ref[...]
    o_ref[...] = out.astype(o_ref.dtype)


# ---------------- one-time parameter preparation (hoisted out of forward) ----------------

def prepare_params(conv_w, conv_b, lin_w, lin_b, spatial):
    """All weight layout work done ONCE at init.

    conv_w: (Cout, Cin, 1, 1)   conv_b: (Cout,)
    lin_w : (A, Cout*spatial)   lin_b : (A,)

    Returns:
      w_big  : (Cin*S, Cout*S)  block-diagonal: w_big[ci*S+s, co*S+s] = conv_w[co, ci]
      b_conv : (1, Cout*S)      b_conv[0, co*S+s] = conv_b[co]
      w_lin_t: (Cout*S, A)
      b_lin  : (1, A)
    """
    cout, cin = conv_w.shape[0], conv_w.shape[1]
    a = lin_w.shape[0]
    S = spatial

    wc = conv_w.reshape(cout, cin).astype(jnp.float32)            # (Cout, Cin)
    eye_s = jnp.eye(S, dtype=jnp.float32)
    # w_big[ci, s, co, t] = wc[co, ci] * delta(s, t)  ->  (Cin*S, Cout*S)
    w_big = jnp.einsum('oc,st->csot', wc, eye_s).reshape(cin * S, cout * S)
    b_conv = jnp.repeat(conv_b.astype(jnp.float32), S).reshape(1, cout * S)
    w_lin_t = lin_w.astype(jnp.float32).T                         # (Cout*S, A)
    b_lin = lin_b.reshape(1, a).astype(jnp.float32)
    return w_big, b_conv, w_lin_t, b_lin


# ---------------- forward ----------------

@jax.jit
def policy_block_forward(x_nchw, w_big, b_conv, w_lin_t, b_lin):
    B, Cin, H, W = x_nchw.shape
    K1 = Cin * H * W                       # conv-matmul contraction dim
    K2, A = w_lin_t.shape                  # linear contraction dim, action dim
    assert w_big.shape == (K1, K2)

    x_flat = x_nchw.reshape(B, K1)         # pure reshape, no transpose / data movement

    # Batch blocking: whole batch in one grid step when small (grid overhead is the
    # dominant cost at these shapes); 128-row blocks for large B so the "parallel"
    # block axis can shard across v7x's two TensorCores.
    bblk = B if B <= 256 else 128
    grid_b = pl.cdiv(B, bblk)
    B_pad = grid_b * bblk
    if B_pad != B:
        x_flat = jnp.pad(x_flat, ((0, B_pad - B), (0, 0)))

    out = pl.pallas_call(
        policy_block_kernel,
        out_shape=jax.ShapeDtypeStruct((B_pad, A), jnp.float32),
        grid=(grid_b,),
        in_specs=[
            pl.BlockSpec((bblk, K1), lambda b: (b, 0)),   # x rows for this block
            pl.BlockSpec((K1, K2), lambda b: (0, 0)),     # block-diag conv weight (resident)
            pl.BlockSpec((1, K2), lambda b: (0, 0)),      # conv bias
            pl.BlockSpec((K2, A), lambda b: (0, 0)),      # linear weight (resident)
            pl.BlockSpec((1, A), lambda b: (0, 0)),       # linear bias
        ],
        out_specs=pl.BlockSpec((bblk, A), lambda b: (b, 0)),
        compiler_params=pltpu.CompilerParams(
            dimension_semantics=("parallel",)),           # megacore-ready batch-block axis
    )(x_flat, w_big, b_conv, w_lin_t, b_lin)
    return out[:B]


# ---------------- plain-JAX reference (PyTorch semantics) ----------------

def policy_block_reference(x_nchw, conv_w, conv_b, lin_w, lin_b):
    B, Cin, H, W = x_nchw.shape
    Cout = conv_w.shape[0]
    y = jnp.einsum('bchw,oc->bohw', x_nchw, conv_w.reshape(Cout, Cin))
    y = y + conv_b.reshape(1, Cout, 1, 1)
    y = jnp.where(y > 0, y, 0.01 * y)
    flat = y.reshape(B, -1)                # PyTorch CHW flatten
    return flat @ lin_w.T + lin_b


# ---------------- main ----------------

if __name__ == "__main__":
    # Shapes consistent with the module:
    #   Linear in_features = state_size * num_filters * 6  =>  H * W = 6 * state_size
    B = 2
    in_channels = 16
    num_filters = 8
    state_size = 8
    H, W = 6, 8                            # H*W = 48 = 6 * state_size
    action_dim = 4
    F = state_size * num_filters * 6       # = num_filters * H * W = 384

    key = jax.random.PRNGKey(0)
    k0, k1, k2, k3, k4 = jax.random.split(key, 5)

    x = jax.random.normal(k0, (B, in_channels, H, W), dtype=jnp.float32)
    conv_w = 0.1 * jax.random.normal(k1, (num_filters, in_channels, 1, 1), dtype=jnp.float32)
    conv_b = 0.1 * jax.random.normal(k2, (num_filters,), dtype=jnp.float32)
    lin_w = 0.05 * jax.random.normal(k3, (action_dim, F), dtype=jnp.float32)
    lin_b = 0.05 * jax.random.normal(k4, (action_dim,), dtype=jnp.float32)

    # one-time weight prep (hoisted out of the forward path)
    w_big, b_conv, w_lin_t, b_lin = prepare_params(conv_w, conv_b, lin_w, lin_b, H * W)

    out = policy_block_forward(x, w_big, b_conv, w_lin_t, b_lin)
    out = jax.block_until_ready(out)

    ref = policy_block_reference(x, conv_w, conv_b, lin_w, lin_b)
    assert out.shape == (B, action_dim)
    assert jnp.allclose(out, ref, atol=2e-4, rtol=2e-4), "mismatch vs reference"

    print("KERNEL_OK")
</pallas_src>

<mosaic_0001>
module attributes {stable_mosaic.version = 11 : i64} {
  func.func @policy_block_kernel(%arg0: i32, %arg1: memref<2x768xf32, #tpu.memory_space<vmem>>, %arg2: memref<768x384xf32, #tpu.memory_space<vmem>>, %arg3: memref<1x384xf32, #tpu.memory_space<vmem>>, %arg4: memref<384x4xf32, #tpu.memory_space<vmem>>, %arg5: memref<1x4xf32, #tpu.memory_space<vmem>>, %arg6: memref<2x4xf32, #tpu.memory_space<vmem>>) attributes {dimension_semantics = [#tpu.dimension_semantics<parallel>], iteration_bounds = array<i64: 1>, scalar_prefetch = 0 : i64, scratch_operands = 0 : i64, tpu.core_type = #tpu.core_type<tc>, window_params = [{transform_indices = @transform_0, window_bounds = array<i64: 2, 768>}, {pipeline_mode = #tpu.pipeline_mode<synchronous>, transform_indices = @transform_1, window_bounds = array<i64: 768, 384>}, {pipeline_mode = #tpu.pipeline_mode<synchronous>, transform_indices = @transform_2, window_bounds = array<i64: 1, 384>}, {pipeline_mode = #tpu.pipeline_mode<synchronous>, transform_indices = @transform_3, window_bounds = array<i64: 384, 4>}, {pipeline_mode = #tpu.pipeline_mode<synchronous>, transform_indices = @transform_4, window_bounds = array<i64: 1, 4>}, {transform_indices = @transform_5, window_bounds = array<i64: 2, 4>}]} {
    %c0 = arith.constant 0 : index
    %c0_0 = arith.constant 0 : index
    %0 = vector.load %arg1[%c0, %c0_0] : memref<2x768xf32, #tpu.memory_space<vmem>>, vector<2x768xf32>
    %c0_1 = arith.constant 0 : index
    %c0_2 = arith.constant 0 : index
    %1 = vector.load %arg2[%c0_1, %c0_2] : memref<768x384xf32, #tpu.memory_space<vmem>>, vector<768x384xf32>
    %cst = arith.constant dense<0.000000e+00> : vector<2x384xf32>
    %2 = tpu.matmul %0, %1, %cst {dimension_numbers = #tpu.dot_dimension_numbers<[1], [0], [0], [1], [0, 0, 1, 1], [], []>} : vector<2x768xf32>, vector<768x384xf32>, vector<2x384xf32> -> vector<2x384xf32>
    %c0_3 = arith.constant 0 : index
    %c0_4 = arith.constant 0 : index
    %3 = vector.load %arg3[%c0_3, %c0_4] : memref<1x384xf32, #tpu.memory_space<vmem>>, vector<1x384xf32>
    %4 = vector.broadcast %3 : vector<1x384xf32> to vector<2x384xf32>
    %5 = arith.addf %2, %4 : vector<2x384xf32>
    %cst_5 = arith.constant 0.00999999977 : f32
    %6 = vector.broadcast %cst_5 : f32 to vector<2x384xf32>
    %7 = arith.mulf %6, %5 : vector<2x384xf32>
    %8 = arith.maximumf %5, %7 : vector<2x384xf32>
    %c0_6 = arith.constant 0 : index
    %c0_7 = arith.constant 0 : index
    %9 = vector.load %arg4[%c0_6, %c0_7] : memref<384x4xf32, #tpu.memory_space<vmem>>, vector<384x4xf32>
    %cst_8 = arith.constant dense<0.000000e+00> : vector<2x4xf32>
    %10 = tpu.matmul %8, %9, %cst_8 {dimension_numbers = #tpu.dot_dimension_numbers<[1], [0], [0], [1], [0, 0, 1, 1], [], []>} : vector<2x384xf32>, vector<384x4xf32>, vector<2x4xf32> -> vector<2x4xf32>
    %c0_9 = arith.constant 0 : index
    %c0_10 = arith.constant 0 : index
    %11 = vector.load %arg5[%c0_9, %c0_10] : memref<1x4xf32, #tpu.memory_space<vmem>>, vector<1x4xf32>
    %12 = vector.broadcast %11 : vector<1x4xf32> to vector<2x4xf32>
    %13 = arith.addf %10, %12 : vector<2x4xf32>
    %c0_11 = arith.constant 0 : index
    %c0_12 = arith.constant 0 : index
    %14 = vector.load %arg6[%c0_11, %c0_12] : memref<2x4xf32, #tpu.memory_space<vmem>>, vector<2x4xf32>
    tpu.vector_store %arg6[%c0_11, %c0_12], %13 {strides = array<i32>} : memref<2x4xf32, #tpu.memory_space<vmem>>, vector<2x4xf32>,
    return
  }
  func.func @transform_0(%arg0: i32) -> (i32, i32) {
    %c0_i32 = arith.constant 0 : i32
    %c0_i32_0 = arith.constant 0 : i32
    return %arg0, %c0_i32 : i32, i32
  }
  func.func @transform_1(%arg0: i32) -> (i32, i32) {
    %c0_i32 = arith.constant 0 : i32
    %c0_i32_0 = arith.constant 0 : i32
    %c0_i32_1 = arith.constant 0 : i32
    return %c0_i32, %c0_i32_0 : i32, i32
  }
  func.func @transform_2(%arg0: i32) -> (i32, i32) {
    %c0_i32 = arith.constant 0 : i32
    %c0_i32_0 = arith.constant 0 : i32
    %c0_i32_1 = arith.constant 0 : i32
    return %c0_i32, %c0_i32_0 : i32, i32
  }
  func.func @transform_3(%arg0: i32) -> (i32, i32) {
    %c0_i32 = arith.constant 0 : i32
    %c0_i32_0 = arith.constant 0 : i32
    %c0_i32_1 = arith.constant 0 : i32
    return %c0_i32, %c0_i32_0 : i32, i32
  }
  func.func @transform_4(%arg0: i32) -> (i32, i32) {
    %c0_i32 = arith.constant 0 : i32
    %c0_i32_0 = arith.constant 0 : i32
    %c0_i32_1 = arith.constant 0 : i32
    return %c0_i32, %c0_i32_0 : i32, i32
  }
  func.func @transform_5(%arg0: i32) -> (i32, i32) {
    %c0_i32 = arith.constant 0 : i32
    %c0_i32_0 = arith.constant 0 : i32
    return %arg0, %c0_i32 : i32, i32
  }
}

</mosaic_0001>

<bundles_post_ra>
// kernel: policy_block_forward.1
= control target key start
LH: loop header
LB: loop body
LE: loop exit
PB: predicated region body
PF: predicated region fallthrough
CT: control target
= control target key end

     0   :  { %10 = vsyncpa [#allocation3], 0  ;;  %s1219_s0 = inlined_call_operand.vmem [shape: f32[2,768], index: 0, kind: input, shape index: {}]   ;;  %s1220_s1 = inlined_call_operand.hbm [shape: f32[768,384], index: 1, kind: input, shape index: {}]   ;;  %s1221_s2 = inlined_call_operand.hbm [shape: f32[1,384], index: 2, kind: input, shape index: {}]   ;;  %s1222_s3 = inlined_call_operand.vmem [shape: f32[384,4], index: 3, kind: input, shape index: {}]   ;;  %s1223_s4 = inlined_call_operand.hbm [shape: f32[1,4], index: 4, kind: input, shape index: {}]   ;;  %s1224_s5 = inlined_call_operand.hbm [shape: f32[2,4], index: 5, kind: output, shape index: {}]  }
   0x1   :  { %11 = vsyncpa [#allocation6], 0  ;;  %s33_s20 = sshll.u32 %s1221_s2, 4  ;;  %s34_s20 = int_to_ptr.hbm [resolvable:$true] %s33_s20 }
   0x2   :  { %12 = vsyncpa [#allocation4], 0  ;;  %s986_s21 = smov [#allocation5]   ;;  %s19_s25 = sshll.u32 %s1220_s1, 4  ;;  %s20_s25 = int_to_ptr.hbm [resolvable:$true] %s19_s25 }
   0x3   :  { %s35_s22 = sshll.u32 %s986_s21, 4  ;;  %s987_s26 = smov [#allocation2]   ;;  %s36_s22 = int_to_ptr.vmem [resolvable:$true] %s35_s22 }
   0x4   :  { %38 = dma.hbm_to_vmem [thread:$0]  %s34_s20, 48, %s36_s22, [#allocation6]  }
   0x5   :  { %s21_s27 = sshll.u32 %s987_s26, 4  ;;  %s988_s28 = smov 384   ;;  %s22_s27 = int_to_ptr.vmem [resolvable:$true] %s21_s27 }
   0x6   :  { %s989_s29 = smov 24   ;;  %s46_s2 = sshll.u32 %s1223_s4, 4  ;;  %s47_s2 = int_to_ptr.hbm [resolvable:$true] %s46_s2 }
   0x7   :  { %27 = dma.hbm_to_vmem [thread:$0]  %s20_s25, 36864, %s22_s27, [#allocation3], %s988_s28, %s988_s28, %s989_s29  }
   0x8   :  { %s990_s7 = smov [#allocation7]  }
   0x9   :  { %s48_s8 = sshll.u32 %s990_s7, 4  ;;  %s49_s8 = int_to_ptr.vmem [resolvable:$true] %s48_s8 }
   0xa   :  { %51 = dma.hbm_to_vmem [thread:$0]  %s47_s2, 16, %s49_s8, [#allocation6]  }
   0xb   :  { %980 = dma.done.wait [#allocation3], 36864  }
   0xc   :  { %981 = vsyncadd [#allocation3], 4294930432 }
   0xd   :  { %982 = dma.done.wait [#allocation6], 64  }
   0xe   :  { %983 = vsyncadd [#allocation6], 4294967232  ;;  %v111_v0 = vld [vmem:[#allocation2 + $0x168] sm:$0xff]  ;;  %v108_v2 = vld [vmem:[#allocation2 + $0x150] sm:$0xff]  ;;  %s866_s22 = sshll.u32 %s1224_s5, 4  ;;  %vm857_vm0 = vcmask 25600   ;;  %s867_s22 = int_to_ptr.hbm [resolvable:$true] %s866_s22 }
   0xf   :  { %v207_v1 = vld [vmem:[#allocation2 + $0x468] sm:$0xff]  ;;  %379 = vmatpush.msra.mxu0 %v111_v0  ;;  %v204_v4 = vld [vmem:[#allocation2 + $0x450] sm:$0xff]  ;;  %v105_v6 = vld [vmem:[#allocation2 + $0x138] sm:$0xff] }
  0x10   :  { %419 = vmatpush.msra.mxu2 %v207_v1  ;;  %v159_v3 = vld [vmem:[#allocation2 + $0x2e8] sm:$0xff]  ;;  %v156_v7 = vld [vmem:[#allocation2 + $0x2d0] sm:$0xff]  ;;  %v201_v8 = vld [vmem:[#allocation2 + $0x438] sm:$0xff] }
  0x11   :  { %v255_v5 = vld [vmem:[#allocation2 + $0x5e8] sm:$0xff]  ;;  %399 = vmatpush.msra.mxu1 %v159_v3  ;;  %380 = vmatpush.msra.mxu0 %v108_v2  ;;  %v252_v9 = vld [vmem:[#allocation2 + $0x5d0] sm:$0xff]  ;;  %v153_v10 = vld [vmem:[#allocation2 + $0x2b8] sm:$0xff] }
  0x12   :  { %439 = vmatpush.msra.mxu3 %v255_v5  ;;  %420 = vmatpush.msra.mxu2 %v204_v4  ;;  %v102_v11 = vld [vmem:[#allocation2 + $0x120] sm:$0xff]  ;;  %v249_v13 = vld [vmem:[#allocation2 + $0x5b8] sm:$0xff]  ;;  %v99_v16 = vld [vmem:[#allocation2 + $0x108] sm:$0xff] }
  0x13   :  { %400 = vmatpush.msra.mxu1 %v156_v7  ;;  %v198_v12 = vld [vmem:[#allocation2 + $0x420] sm:$0xff]  ;;  %381 = vmatpush.msra.mxu0 %v105_v6  ;;  %v195_v17 = vld [vmem:[#allocation2 + $0x408] sm:$0xff]  ;;  %v96_v20 = vld [vmem:[#allocation2 + $0xf0] sm:$0xff] }
  0x14   :  { %440 = vmatpush.msra.mxu3 %v252_v9  ;;  %421 = vmatpush.msra.mxu2 %v201_v8  ;;  %v150_v14 = vld [vmem:[#allocation2 + $0x2a0] sm:$0xff]  ;;  %v147_v18 = vld [vmem:[#allocation2 + $0x288] sm:$0xff]  ;;  %v192_v21 = vld [vmem:[#allocation2 + $0x3f0] sm:$0xff] }
  0x15   :  { %v246_v15 = vld [vmem:[#allocation2 + $0x5a0] sm:$0xff]  ;;  %401 = vmatpush.msra.mxu1 %v153_v10  ;;  %382 = vmatpush.msra.mxu0 %v102_v11  ;;  %v243_v19 = vld [vmem:[#allocation2 + $0x588] sm:$0xff]  ;;  %v144_v22 = vld [vmem:[#allocation2 + $0x270] sm:$0xff] }
  0x16   :  { %441 = vmatpush.msra.mxu3 %v249_v13  ;;  %422 = vmatpush.msra.mxu2 %v198_v12  ;;  %v240_v23 = vld [vmem:[#allocation2 + $0x570] sm:$0xff]  ;;  %v93_v24 = vld [vmem:[#allocation2 + $0xd8] sm:$0xff]  ;;  %v90_v28 = vld [vmem:[#allocation2 + $0xc0] sm:$0xff] }
  0x17   :  { %402 = vmatpush.msra.mxu1 %v150_v14  ;;  %383 = vmatpush.msra.mxu0 %v99_v16  ;;  %v189_v25 = vld [vmem:[#allocation2 + $0x3d8] sm:$0xff]  ;;  %v186_v29 = vld [vmem:[#allocation2 + $0x3c0] sm:$0xff]  ;;  %v87_v32 = vld [vmem:[#allocation2 + $0xa8] sm:$0xff] }
  0x18   :  { %442 = vmatpush.msra.mxu3 %v246_v15  ;;  %423 = vmatpush.msra.mxu2 %v195_v17  ;;  %v141_v26 = vld [vmem:[#allocation2 + $0x258] sm:$0xff]  ;;  %v138_v30 = vld [vmem:[#allocation2 + $0x240] sm:$0xff]  ;;  %v183_v33 = vld [vmem:[#allocation2 + $0x3a8] sm:$0xff] }
  0x19   :  { %403 = vmatpush.msra.mxu1 %v147_v18  ;;  %384 = vmatpush.msra.mxu0 %v96_v20  ;;  %v237_v27 = vld [vmem:[#allocation2 + $0x558] sm:$0xff]  ;;  %v234_v31 = vld [vmem:[#allocation2 + $0x540] sm:$0xff]  ;;  %v135_v34 = vld [vmem:[#allocation2 + $0x228] sm:$0xff] }
  0x1a   :  { %443 = vmatpush.msra.mxu3 %v243_v19  ;;  %424 = vmatpush.msra.mxu2 %v192_v21  ;;  %v231_v35 = vld [vmem:[#allocation2 + $0x528] sm:$0xff]  ;;  %v84_v36 = vld [vmem:[#allocation2 + $0x90] sm:$0xff]  ;;  %v81_v40 = vld [vmem:[#allocation2 + $0x78] sm:$0xff] }
  0x1b   :  { %404 = vmatpush.msra.mxu1 %v144_v22  ;;  %385 = vmatpush.msra.mxu0 %v93_v24  ;;  %v180_v37 = vld [vmem:[#allocation2 + $0x390] sm:$0xff]  ;;  %v177_v41 = vld [vmem:[#allocation2 + $0x378] sm:$0xff]  ;;  %v78_v44 = vld [vmem:[#allocation2 + $0x60] sm:$0xff] }
  0x1c   :  { %444 = vmatpush.msra.mxu3 %v240_v23  ;;  %425 = vmatpush.msra.mxu2 %v189_v25  ;;  %v132_v38 = vld [vmem:[#allocation2 + $0x210] sm:$0xff]  ;;  %v129_v42 = vld [vmem:[#allocation2 + $0x1f8] sm:$0xff]  ;;  %v174_v45 = vld [vmem:[#allocation2 + $0x360] sm:$0xff] }
  0x1d   :  { %405 = vmatpush.msra.mxu1 %v141_v26  ;;  %386 = vmatpush.msra.mxu0 %v90_v28  ;;  %v228_v39 = vld [vmem:[#allocation2 + $0x510] sm:$0xff]  ;;  %v225_v43 = vld [vmem:[#allocation2 + $0x4f8] sm:$0xff]  ;;  %v126_v46 = vld [vmem:[#allocation2 + $0x1e0] sm:$0xff] }
  0x1e   :  { %445 = vmatpush.msra.mxu3 %v237_v27  ;;  %426 = vmatpush.msra.mxu2 %v186_v29  ;;  %v222_v47 = vld [vmem:[#allocation2 + $0x4e0] sm:$0xff]  ;;  %v75_v48 = vld [vmem:[#allocation2 + $0x48] sm:$0xff]  ;;  %v72_v52 = vld [vmem:[#allocation2 + $0x30] sm:$0xff] }
  0x1f   :  { %406 = vmatpush.msra.mxu1 %v138_v30  ;;  %387 = vmatpush.msra.mxu0 %v87_v32  ;;  %v171_v49 = vld [vmem:[#allocation2 + $0x348] sm:$0xff]  ;;  %v168_v53 = vld [vmem:[#allocation2 + $0x330] sm:$0xff]  ;;  %v69_v56 = vld [vmem:[#allocation2 + $0x18] sm:$0xff] }
  0x20   :  { %446 = vmatpush.msra.mxu3 %v234_v31  ;;  %427 = vmatpush.msra.mxu2 %v183_v33  ;;  %v123_v50 = vld [vmem:[#allocation2 + $0x1c8] sm:$0xff]  ;;  %v120_v54 = vld [vmem:[#allocation2 + $0x1b0] sm:$0xff]  ;;  %v165_v57 = vld [vmem:[#allocation2 + $0x318] sm:$0xff] }
  0x21   :  { %407 = vmatpush.msra.mxu1 %v135_v34  ;;  %388 = vmatpush.msra.mxu0 %v84_v36  ;;  %v219_v51 = vld [vmem:[#allocation2 + $0x4c8] sm:$0xff]  ;;  %v216_v55 = vld [vmem:[#allocation2 + $0x4b0] sm:$0xff]  ;;  %v117_v58 = vld [vmem:[#allocation2 + $0x198] sm:$0xff] }
  0x22   :  { %447 = vmatpush.msra.mxu3 %v231_v35  ;;  %428 = vmatpush.msra.mxu2 %v180_v37  ;;  %v213_v59 = vld [vmem:[#allocation2 + $0x498] sm:$0xff]  ;;  %v66_v60 = vld [vmem:[#allocation2] sm:$0xff]  ;;  %v303_v62 = vld [vmem:[#allocation2 + $0x768] sm:$0xff] }
  0x23   :  { %408 = vmatpush.msra.mxu1 %v132_v38  ;;  %389 = vmatpush.msra.mxu0 %v81_v40  ;;  %v162_v61 = vld [vmem:[#allocation2 + $0x300] sm:$0xff]  ;;  %v112_v63 = vld [vmem:[#allocation2 + $0x170] sm:$0xff]  ;;  %v351_v3 = vld [vmem:[#allocation2 + $0x8e8] sm:$0xff] }
  0x24   :  { %448 = vmatpush.msra.mxu3 %v228_v39  ;;  %429 = vmatpush.msra.mxu2 %v177_v41  ;;  %v114_v0 = vld [vmem:[#allocation2 + $0x180] sm:$0xff]  ;;  %v300_v2 = vld [vmem:[#allocation2 + $0x750] sm:$0xff]  ;;  %v109_v4 = vld [vmem:[#allocation2 + $0x158] sm:$0xff] }
  0x25   :  { %409 = vmatpush.msra.mxu1 %v129_v42  ;;  %390 = vmatpush.msra.mxu0 %v78_v44  ;;  %v210_v1 = vld [vmem:[#allocation2 + $0x480] sm:$0xff]  ;;  %v160_v5 = vld [vmem:[#allocation2 + $0x2f0] sm:$0xff]  ;;  %v297_v6 = vld [vmem:[#allocation2 + $0x738] sm:$0xff] }
  0x26   :  { %449 = vmatpush.msra.mxu3 %v225_v43  ;;  %430 = vmatpush.msra.mxu2 %v174_v45  ;;  %v348_v7 = vld [vmem:[#allocation2 + $0x8d0] sm:$0xff]  ;;  %v106_v8 = vld [vmem:[#allocation2 + $0x140] sm:$0xff]  ;;  %v157_v9 = vld [vmem:[#allocation2 + $0x2d8] sm:$0xff] }
  0x27   :  { %410 = vmatpush.msra.mxu1 %v126_v46  ;;  %391 = vmatpush.msra.mxu0 %v75_v48  ;;  %v294_v10 = vld [vmem:[#allocation2 + $0x720] sm:$0xff]  ;;  %v345_v11 = vld [vmem:[#allocation2 + $0x8b8] sm:$0xff]  ;;  %v103_v12 = vld [vmem:[#allocation2 + $0x128] sm:$0xff] }
  0x28   :  { %450 = vmatpush.msra.mxu3 %v222_v47  ;;  %431 = vmatpush.msra.mxu2 %v171_v49  ;;  %v154_v13 = vld [vmem:[#allocation2 + $0x2c0] sm:$0xff]  ;;  %v291_v14 = vld [vmem:[#allocation2 + $0x708] sm:$0xff]  ;;  %v100_v16 = vld [vmem:[#allocation2 + $0x110] sm:$0xff] }
  0x29   :  { %411 = vmatpush.msra.mxu1 %v123_v50  ;;  %392 = vmatpush.msra.mxu0 %v72_v52  ;;  %v342_v15 = vld [vmem:[#allocation2 + $0x8a0] sm:$0xff]  ;;  %v151_v17 = vld [vmem:[#allocation2 + $0x2a8] sm:$0xff]  ;;  %v288_v18 = vld [vmem:[#allocation2 + $0x6f0] sm:$0xff] }
  0x2a   :  { %451 = vmatpush.msra.mxu3 %v219_v51  ;;  %432 = vmatpush.msra.mxu2 %v168_v53  ;;  %v339_v19 = vld [vmem:[#allocation2 + $0x888] sm:$0xff]  ;;  %v64_v20 = vld [vmem:[%s1219_s0] sm:$0xff]  ;;  %v148_v22 = vld [vmem:[#allocation2 + $0x290] sm:$0xff] }
  0x2b   :  { %412 = vmatpush.msra.mxu1 %v120_v54  ;;  %393 = vmatpush.msra.mxu0 %v69_v56  ;;  %v97_v21 = vld [vmem:[#allocation2 + $0xf8] sm:$0xff]  ;;  %364 = vst [vmem:[#allocation1] ss:$4 sm:$0xff] %v64_v20  ;;  %v336_v24 = vld [vmem:[#allocation2 + $0x870] sm:$0xff]  ;;  %v94_v25 = vld [vmem:[#allocation2 + $0xe0] sm:$0xff] }
  0x2c   :  { %452 = vmatpush.msra.mxu3 %v216_v55  ;;  %433 = vmatpush.msra.mxu2 %v165_v57  ;;  %v285_v23 = vld [vmem:[#allocation2 + $0x6d8] sm:$0xff]  ;;  %v282_v27 = vld [vmem:[#allocation2 + $0x6c0] sm:$0xff]  ;;  %v91_v29 = vld [vmem:[#allocation2 + $0xc8] sm:$0xff] }
  0x2d   :  { %413 = vmatpush.msra.mxu1 %v117_v58  ;;  %394 = vmatpush.msra.mxu0 %v66_v60  ;;  %v145_v26 = vld [vmem:[#allocation2 + $0x278] sm:$0xff]  ;;  %v142_v30 = vld [vmem:[#allocation2 + $0x260] sm:$0xff]  ;;  %v279_v31 = vld [vmem:[#allocation2 + $0x6a8] sm:$0xff] }
  0x2e   :  { %453 = vmatpush.msra.mxu3 %v213_v59  ;;  %434 = vmatpush.msra.mxu2 %v162_v61  ;;  %v333_v28 = vld [vmem:[#allocation2 + $0x858] sm:$0xff]  ;;  %v330_v32 = vld [vmem:[#allocation2 + $0x840] sm:$0xff]  ;;  %v88_v33 = vld [vmem:[#allocation2 + $0xb0] sm:$0xff] }
  0x2f   :  { %459 = vmatpush.msrb.mxu0 %v303_v62  ;;  %414 = vmatpush.msra.mxu1 %v114_v0  ;;  %v139_v34 = vld [vmem:[#allocation2 + $0x248] sm:$0xff]  ;;  %v65_v35 = vld [vmem:[%s1219_s0 + $0x8] sm:$0xf]  ;;  %v276_v36 = vld [vmem:[#allocation2 + $0x690] sm:$0xff] }
  0x30   :  { %499 = vmatpush.msrb.mxu2 %v112_v63  ;;  %454 = vmatpush.msra.mxu3 %v210_v1  ;;  %v327_v37 = vld [vmem:[#allocation2 + $0x828] sm:$0xff]  ;;  %v85_v38 = vld [vmem:[#allocation2 + $0x98] sm:$0xff]  ;;  %v136_v39 = vld [vmem:[#allocation2 + $0x230] sm:$0xff]  ;;  %366 = vst [vmem:[#allocation1 + $0x20] ss:$4 sm:$0xff] %v65_v35 }
  0x31   :  { %460 = vmatpush.msrb.mxu0 %v300_v2  ;;  %479 = vmatpush.msrb.mxu1 %v351_v3  ;;  %v273_v40 = vld [vmem:[#allocation2 + $0x678] sm:$0xff]  ;;  %v324_v41 = vld [vmem:[#allocation2 + $0x810] sm:$0xff]  ;;  %v82_v42 = vld [vmem:[#allocation2 + $0x80] sm:$0xff] }
  0x32   :  { %500 = vmatpush.msrb.mxu2 %v109_v4  ;;  %519 = vmatpush.msrb.mxu3 %v160_v5  ;;  %v133_v43 = vld [vmem:[#allocation2 + $0x218] sm:$0xff]  ;;  %v270_v44 = vld [vmem:[#allocation2 + $0x660] sm:$0xff]  ;;  %v79_v46 = vld [vmem:[#allocation2 + $0x68] sm:$0xff] }
  0x33   :  { %461 = vmatpush.msrb.mxu0 %v297_v6  ;;  %480 = vmatpush.msrb.mxu1 %v348_v7  ;;  %v321_v45 = vld [vmem:[#allocation2 + $0x7f8] sm:$0xff]  ;;  %v130_v47 = vld [vmem:[#allocation2 + $0x200] sm:$0xff]  ;;  %v267_v48 = vld [vmem:[#allocation2 + $0x648] sm:$0xff] }
  0x34   :  { %501 = vmatpush.msrb.mxu2 %v106_v8  ;;  %520 = vmatpush.msrb.mxu3 %v157_v9  ;;  %v318_v49 = vld [vmem:[#allocation2 + $0x7e0] sm:$0xff]  ;;  %v76_v50 = vld [vmem:[#allocation2 + $0x50] sm:$0xff]  ;;  %v127_v51 = vld [vmem:[#allocation2 + $0x1e8] sm:$0xff] }
  0x35   :  { %462 = vmatpush.msrb.mxu0 %v294_v10  ;;  %481 = vmatpush.msrb.mxu1 %v345_v11  ;;  %v264_v52 = vld [vmem:[#allocation2 + $0x630] sm:$0xff]  ;;  %v315_v53 = vld [vmem:[#allocation2 + $0x7c8] sm:$0xff]  ;;  %v73_v54 = vld [vmem:[#allocation2 + $0x38] sm:$0xff] }
  0x36   :  { %502 = vmatpush.msrb.mxu2 %v103_v12  ;;  %521 = vmatpush.msrb.mxu3 %v154_v13  ;;  %v124_v55 = vld [vmem:[#allocation2 + $0x1d0] sm:$0xff]  ;;  %v1037_v56 = vld.sshfl [vmem:[#allocation1 + $0x10] sm:$0xff pattern:$0x73625140]  ;;  %v261_v57 = vld [vmem:[#allocation2 + $0x618] sm:$0xff] }
  0x37   :  { %463 = vmatpush.msrb.mxu0 %v291_v14  ;;  %482 = vmatpush.msrb.mxu1 %v342_v15  ;;  %v312_v58 = vld [vmem:[#allocation2 + $0x7b0] sm:$0xff]  ;;  %v70_v59 = vld [vmem:[#allocation2 + $0x20] sm:$0xff]  ;;  %v121_v60 = vld [vmem:[#allocation2 + $0x1b8] sm:$0xff] }
  0x38   :  { %503 = vmatpush.msrb.mxu2 %v100_v16  ;;  %522 = vmatpush.msrb.mxu3 %v151_v17  ;;  %v1039_v61 = vld.sshfl [vmem:[#allocation1] sm:$0xff pattern:$0x73625140]  ;;  %v1042_v62 = vld.sshfl [vmem:[#allocation1 + $0x18] sm:$0xff pattern:$0x73625140] }
  0x39   :  { %464 = vmatpush.msrb.mxu0 %v288_v18  ;;  %483 = vmatpush.msrb.mxu1 %v339_v19  ;;  %v258_v63 = vld [vmem:[#allocation2 + $0x600] sm:$0xff]  ;;  %v309_v0 = vld [vmem:[#allocation2 + $0x798] sm:$0xff]  ;;  %v67_v1 = vld [vmem:[#allocation2 + $0x8] sm:$0xff] }
  0x3a   :  { %504 = vmatpush.msrb.mxu2 %v97_v21  ;;  %523 = vmatpush.msrb.mxu3 %v148_v22  ;;  %v118_v2 = vld [vmem:[#allocation2 + $0x1a0] sm:$0xff]  ;;  %v208_v4 = vld [vmem:[#allocation2 + $0x470] sm:$0xff]  ;;  %v115_v7 = vld [vmem:[#allocation2 + $0x188] sm:$0xff] }
  0x3b   :  { %465 = vmatpush.msrb.mxu0 %v285_v23  ;;  %484 = vmatpush.msrb.mxu1 %v336_v24  ;;  %v1045_v3 = vld.sshfl [vmem:[#allocation1 + $0x8] sm:$0xff pattern:$0x73625140]  ;;  %v304_v5 = vld [vmem:[#allocation2 + $0x770] sm:$0xff]  ;;  %v205_v8 = vld [vmem:[#allocation2 + $0x458] sm:$0xff] }
  0x3c   :  { %505 = vmatpush.msrb.mxu2 %v94_v25  ;;  %524 = vmatpush.msrb.mxu3 %v145_v26  ;;  %v306_v6 = vld [vmem:[#allocation2 + $0x780] sm:$0xff]  ;;  %v256_v9 = vld [vmem:[#allocation2 + $0x5f0] sm:$0xff]  ;;  %v301_v10 = vld [vmem:[#allocation2 + $0x758] sm:$0xff] }
  0x3d   :  { %466 = vmatpush.msrb.mxu0 %v282_v27  ;;  %485 = vmatpush.msrb.mxu1 %v333_v28  ;;  %v352_v11 = vld [vmem:[#allocation2 + $0x8f0] sm:$0xff]  ;;  %v202_v12 = vld [vmem:[#allocation2 + $0x440] sm:$0xff]  ;;  %v253_v13 = vld [vmem:[#allocation2 + $0x5d8] sm:$0xff] }
  0x3e   :  { %506 = vmatpush.msrb.mxu2 %v91_v29  ;;  %525 = vmatpush.msrb.mxu3 %v142_v30  ;;  %v298_v14 = vld [vmem:[#allocation2 + $0x740] sm:$0xff]  ;;  %v349_v15 = vld [vmem:[#allocation2 + $0x8d8] sm:$0xff]  ;;  %v199_v18 = vld [vmem:[#allocation2 + $0x428] sm:$0xff] }
  0x3f   :  { %467 = vmatpush.msrb.mxu0 %v279_v31  ;;  %486 = vmatpush.msrb.mxu1 %v330_v32  ;;  %v1049_v16 = vld.sshfl [vmem:[#allocation1 + $0x20] sm:$0xff pattern:$0x73625140]  ;;  %v250_v17 = vld [vmem:[#allocation2 + $0x5c0] sm:$0xff]  ;;  %v295_v19 = vld [vmem:[#allocation2 + $0x728] sm:$0xff] }
  0x40   :  { %507 = vmatpush.msrb.mxu2 %v88_v33  ;;  %526 = vmatpush.msrb.mxu3 %v139_v34  ;;  %v346_v20 = vld [vmem:[#allocation2 + $0x8c0] sm:$0xff]  ;;  %v196_v22 = vld [vmem:[#allocation2 + $0x410] sm:$0xff]  ;;  %v247_v23 = vld [vmem:[#allocation2 + $0x5a8] sm:$0xff] }
  0x41   :  { %468 = vmatpush.msrb.mxu0 %v276_v36  ;;  %487 = vmatpush.msrb.mxu1 %v327_v37  ;;  %v1051_v21 = vld.sshfl [vmem:[#allocation1 + $0x28] sm:$0xff pattern:$0x73625140]  ;;  %v292_v24 = vld [vmem:[#allocation2 + $0x710] sm:$0xff]  ;;  %v343_v25 = vld [vmem:[#allocation2 + $0x8a8] sm:$0xff] }
  0x42   :  { %508 = vmatpush.msrb.mxu2 %v85_v38  ;;  %527 = vmatpush.msrb.mxu3 %v136_v39  ;;  %v193_v26 = vld [vmem:[#allocation2 + $0x3f8] sm:$0xff]  ;;  %v244_v27 = vld [vmem:[#allocation2 + $0x590] sm:$0xff]  ;;  %v190_v30 = vld [vmem:[#allocation2 + $0x3e0] sm:$0xff] }
  0x43   :  { %469 = vmatpush.msrb.mxu0 %v273_v40  ;;  %488 = vmatpush.msrb.mxu1 %v324_v41  ;;  %v289_v28 = vld [vmem:[#allocation2 + $0x6f8] sm:$0xff]  ;;  %v340_v29 = vld [vmem:[#allocation2 + $0x890] sm:$0xff]  ;;  %v286_v32 = vld [vmem:[#allocation2 + $0x6e0] sm:$0xff] }
  0x44   :  { %509 = vmatpush.msrb.mxu2 %v82_v42  ;;  %528 = vmatpush.msrb.mxu3 %v133_v43  ;;  %v241_v31 = vld [vmem:[#allocation2 + $0x578] sm:$0xff]  ;;  %v187_v34 = vld [vmem:[#allocation2 + $0x3c8] sm:$0xff]  ;;  %v238_v35 = vld [vmem:[#allocation2 + $0x560] sm:$0xff] }
  0x45   :  { %470 = vmatpush.msrb.mxu0 %v270_v44  ;;  %489 = vmatpush.msrb.mxu1 %v321_v45  ;;  %v337_v33 = vld [vmem:[#allocation2 + $0x878] sm:$0xff]  ;;  %v283_v36 = vld [vmem:[#allocation2 + $0x6c8] sm:$0xff]  ;;  %v334_v37 = vld [vmem:[#allocation2 + $0x860] sm:$0xff] }
  0x46   :  { %510 = vmatpush.msrb.mxu2 %v79_v46  ;;  %529 = vmatpush.msrb.mxu3 %v130_v47  ;;  %v184_v38 = vld [vmem:[#allocation2 + $0x3b0] sm:$0xff]  ;;  %v235_v39 = vld [vmem:[#allocation2 + $0x548] sm:$0xff]  ;;  %v181_v42 = vld [vmem:[#allocation2 + $0x398] sm:$0xff] }
  0x47   :  { %471 = vmatpush.msrb.mxu0 %v267_v48  ;;  %490 = vmatpush.msrb.mxu1 %v318_v49  ;;  %v280_v40 = vld [vmem:[#allocation2 + $0x6b0] sm:$0xff]  ;;  %v331_v41 = vld [vmem:[#allocation2 + $0x848] sm:$0xff]  ;;  %v277_v44 = vld [vmem:[#allocation2 + $0x698] sm:$0xff] }
  0x48   :  { %511 = vmatpush.msrb.mxu2 %v76_v50  ;;  %530 = vmatpush.msrb.mxu3 %v127_v51  ;;  %v232_v43 = vld [vmem:[#allocation2 + $0x530] sm:$0xff]  ;;  %v178_v46 = vld [vmem:[#allocation2 + $0x380] sm:$0xff]  ;;  %v229_v47 = vld [vmem:[#allocation2 + $0x518] sm:$0xff] }
  0x49   :  { %472 = vmatpush.msrb.mxu0 %v264_v52  ;;  %491 = vmatpush.msrb.mxu1 %v315_v53  ;;  %v328_v45 = vld [vmem:[#allocation2 + $0x830] sm:$0xff]  ;;  %v274_v48 = vld [vmem:[#allocation2 + $0x680] sm:$0xff]  ;;  %v325_v49 = vld [vmem:[#allocation2 + $0x818] sm:$0xff] }
  0x4a   :  { %512 = vmatpush.msrb.mxu2 %v73_v54  ;;  %531 = vmatpush.msrb.mxu3 %v124_v55  ;;  %v175_v50 = vld [vmem:[#allocation2 + $0x368] sm:$0xff]  ;;  %v226_v51 = vld [vmem:[#allocation2 + $0x500] sm:$0xff]  ;;  %v172_v54 = vld [vmem:[#allocation2 + $0x350] sm:$0xff] }
  0x4b   :  { %435 = vmatmul.f32.vlgmr.msra.gmra.mxu2 %v1037_v56  ;;  %473 = vmatpush.msrb.mxu0 %v261_v57  ;;  %v271_v52 = vld [vmem:[#allocation2 + $0x668] sm:$0xff]  ;;  %v322_v53 = vld [vmem:[#allocation2 + $0x800] sm:$0xff]  ;;  %v268_v57 = vld [vmem:[#allocation2 + $0x650] sm:$0xff] }
  0x4c   :  { %492 = vmatpush.msrb.mxu1 %v312_v58  ;;  %513 = vmatpush.msrb.mxu2 %v70_v59  ;;  %v223_v55 = vld [vmem:[#allocation2 + $0x4e8] sm:$0xff]  ;;  %v169_v59 = vld [vmem:[#allocation2 + $0x338] sm:$0xff] }
  0x4d   :  { %532 = vmatpush.msrb.mxu3 %v121_v60  ;;  %395 = vmatmul.f32.vlgmr.msra.gmra.mxu0 %v1039_v61  ;;  %v319_v58 = vld [vmem:[#allocation2 + $0x7e8] sm:$0xff]  ;;  %v220_v60 = vld [vmem:[#allocation2 + $0x4d0] sm:$0xff] }
  0x4e   :  { %455 = vmatmul.f32.vlgmr.msra.gmra.mxu3 %v1042_v62  ;;  %474 = vmatpush.msrb.mxu0 %v258_v63  ;;  %v265_v63 = vld [vmem:[#allocation2 + $0x638] sm:$0xff] }
  0x4f   :  { %493 = vmatpush.msrb.mxu1 %v309_v0  ;;  %514 = vmatpush.msrb.mxu2 %v67_v1  ;;  %v316_v0 = vld [vmem:[#allocation2 + $0x7d0] sm:$0xff]  ;;  %v166_v1 = vld [vmem:[#allocation2 + $0x320] sm:$0xff] }
  0x50   :  { %533 = vmatpush.msrb.mxu3 %v118_v2  ;;  %415 = vmatmul.f32.vlgmr.msra.gmra.mxu1 %v1045_v3  ;;  %v217_v2 = vld [vmem:[#allocation2 + $0x4b8] sm:$0xff] }
  0x51   :  { %539 = vmatpush.msra.mxu0 %v208_v4  ;;  %579 = vmatpush.msra.mxu2 %v304_v5  ;;  %v262_v4 = vld [vmem:[#allocation2 + $0x620] sm:$0xff]  ;;  %v313_v5 = vld [vmem:[#allocation2 + $0x7b8] sm:$0xff] }
  0x52   :  { %494 = vmatpush.msrb.mxu1 %v306_v6  ;;  %534 = vmatpush.msrb.mxu3 %v115_v7  ;;  %v163_v6 = vld [vmem:[#allocation2 + $0x308] sm:$0xff]  ;;  %v214_v7 = vld [vmem:[#allocation2 + $0x4a0] sm:$0xff] }
  0x53   :  { %540 = vmatpush.msra.mxu0 %v205_v8  ;;  %580 = vmatpush.msra.mxu2 %v301_v10  ;;  %v259_v8 = vld [vmem:[#allocation2 + $0x608] sm:$0xff]  ;;  %v113_v10 = vld [vmem:[#allocation2 + $0x178] sm:$0xff] }
  0x54   :  { %559 = vmatpush.msra.mxu1 %v256_v9  ;;  %599 = vmatpush.msra.mxu3 %v352_v11  ;;  %v310_v9 = vld [vmem:[#allocation2 + $0x7a0] sm:$0xff]  ;;  %v211_v11 = vld [vmem:[#allocation2 + $0x488] sm:$0xff] }
  0x55   :  { %541 = vmatpush.msra.mxu0 %v202_v12  ;;  %581 = vmatpush.msra.mxu2 %v298_v14  ;;  %v307_v12 = vld [vmem:[#allocation2 + $0x788] sm:$0xff]  ;;  %v161_v14 = vld [vmem:[#allocation2 + $0x2f8] sm:$0xff] }
  0x56   :  { %560 = vmatpush.msra.mxu1 %v253_v13  ;;  %600 = vmatpush.msra.mxu3 %v349_v15  ;;  %v110_v13 = vld [vmem:[#allocation2 + $0x160] sm:$0xff]  ;;  %v209_v15 = vld [vmem:[#allocation2 + $0x478] sm:$0xff] }
  0x57   :  { %475 = vmatmul.f32.vlgmr.msrb.gmra.mxu0 %v1049_v16  ;;  %582 = vmatpush.msra.mxu2 %v295_v19  ;;  %v206_v19 = vld [vmem:[#allocation2 + $0x460] sm:$0xff] }
  0x58   :  { %561 = vmatpush.msra.mxu1 %v250_v17  ;;  %542 = vmatpush.msra.mxu0 %v199_v18  ;;  %v107_v17 = vld [vmem:[#allocation2 + $0x148] sm:$0xff]  ;;  %v158_v18 = vld [vmem:[#allocation2 + $0x2e0] sm:$0xff] }
  0x59   :  { %601 = vmatpush.msra.mxu3 %v346_v20  ;;  %495 = vmatmul.f32.vlgmr.msrb.gmra.mxu1 %v1051_v21  ;;  %v257_v20 = vld [vmem:[#allocation2 + $0x5f8] sm:$0xff] }
  0x5a   :  { %543 = vmatpush.msra.mxu0 %v196_v22  ;;  %562 = vmatpush.msra.mxu1 %v247_v23  ;;  %v104_v22 = vld [vmem:[#allocation2 + $0x130] sm:$0xff]  ;;  %v155_v23 = vld [vmem:[#allocation2 + $0x2c8] sm:$0xff] }
  0x5b   :  { %583 = vmatpush.msra.mxu2 %v292_v24  ;;  %602 = vmatpush.msra.mxu3 %v343_v25  ;;  %v203_v24 = vld [vmem:[#allocation2 + $0x448] sm:$0xff]  ;;  %v254_v25 = vld [vmem:[#allocation2 + $0x5e0] sm:$0xff] }
  0x5c   :  { %544 = vmatpush.msra.mxu0 %v193_v26  ;;  %563 = vmatpush.msra.mxu1 %v244_v27  ;;  %v101_v26 = vld [vmem:[#allocation2 + $0x118] sm:$0xff]  ;;  %v152_v27 = vld [vmem:[#allocation2 + $0x2b0] sm:$0xff] }
  0x5d   :  { %584 = vmatpush.msra.mxu2 %v289_v28  ;;  %603 = vmatpush.msra.mxu3 %v340_v29  ;;  %v200_v28 = vld [vmem:[#allocation2 + $0x430] sm:$0xff]  ;;  %v251_v29 = vld [vmem:[#allocation2 + $0x5c8] sm:$0xff] }
  0x5e   :  { %545 = vmatpush.msra.mxu0 %v190_v30  ;;  %564 = vmatpush.msra.mxu1 %v241_v31  ;;  %v98_v30 = vld [vmem:[#allocation2 + $0x100] sm:$0xff]  ;;  %v149_v31 = vld [vmem:[#allocation2 + $0x298] sm:$0xff] }
  0x5f   :  { %585 = vmatpush.msra.mxu2 %v286_v32  ;;  %604 = vmatpush.msra.mxu3 %v337_v33  ;;  %v197_v32 = vld [vmem:[#allocation2 + $0x418] sm:$0xff]  ;;  %v248_v33 = vld [vmem:[#allocation2 + $0x5b0] sm:$0xff] }
  0x60   :  { %546 = vmatpush.msra.mxu0 %v187_v34  ;;  %565 = vmatpush.msra.mxu1 %v238_v35  ;;  %v95_v34 = vld [vmem:[#allocation2 + $0xe8] sm:$0xff]  ;;  %v146_v35 = vld [vmem:[#allocation2 + $0x280] sm:$0xff] }
  0x61   :  { %586 = vmatpush.msra.mxu2 %v283_v36  ;;  %605 = vmatpush.msra.mxu3 %v334_v37  ;;  %v194_v36 = vld [vmem:[#allocation2 + $0x400] sm:$0xff]  ;;  %v245_v37 = vld [vmem:[#allocation2 + $0x598] sm:$0xff] }
  0x62   :  { %547 = vmatpush.msra.mxu0 %v184_v38  ;;  %566 = vmatpush.msra.mxu1 %v235_v39  ;;  %v92_v38 = vld [vmem:[#allocation2 + $0xd0] sm:$0xff]  ;;  %v143_v39 = vld [vmem:[#allocation2 + $0x268] sm:$0xff] }
  0x63   :  { %587 = vmatpush.msra.mxu2 %v280_v40  ;;  %606 = vmatpush.msra.mxu3 %v331_v41  ;;  %v191_v40 = vld [vmem:[#allocation2 + $0x3e8] sm:$0xff]  ;;  %v242_v41 = vld [vmem:[#allocation2 + $0x580] sm:$0xff] }
  0x64   :  { %548 = vmatpush.msra.mxu0 %v181_v42  ;;  %567 = vmatpush.msra.mxu1 %v232_v43  ;;  %v89_v42 = vld [vmem:[#allocation2 + $0xb8] sm:$0xff]  ;;  %v140_v43 = vld [vmem:[#allocation2 + $0x250] sm:$0xff] }
  0x65   :  { %588 = vmatpush.msra.mxu2 %v277_v44  ;;  %607 = vmatpush.msra.mxu3 %v328_v45  ;;  %v188_v44 = vld [vmem:[#allocation2 + $0x3d0] sm:$0xff]  ;;  %v239_v45 = vld [vmem:[#allocation2 + $0x568] sm:$0xff] }
  0x66   :  { %549 = vmatpush.msra.mxu0 %v178_v46  ;;  %568 = vmatpush.msra.mxu1 %v229_v47  ;;  %v86_v46 = vld [vmem:[#allocation2 + $0xa0] sm:$0xff]  ;;  %v137_v47 = vld [vmem:[#allocation2 + $0x238] sm:$0xff] }
  0x67   :  { %589 = vmatpush.msra.mxu2 %v274_v48  ;;  %608 = vmatpush.msra.mxu3 %v325_v49  ;;  %v185_v48 = vld [vmem:[#allocation2 + $0x3b8] sm:$0xff]  ;;  %v236_v49 = vld [vmem:[#allocation2 + $0x550] sm:$0xff] }
  0x68   :  { %550 = vmatpush.msra.mxu0 %v175_v50  ;;  %569 = vmatpush.msra.mxu1 %v226_v51  ;;  %v83_v50 = vld [vmem:[#allocation2 + $0x88] sm:$0xff]  ;;  %v134_v51 = vld [vmem:[#allocation2 + $0x220] sm:$0xff] }
  0x69   :  { %590 = vmatpush.msra.mxu2 %v271_v52  ;;  %609 = vmatpush.msra.mxu3 %v322_v53  ;;  %v182_v52 = vld [vmem:[#allocation2 + $0x3a0] sm:$0xff]  ;;  %v233_v53 = vld [vmem:[#allocation2 + $0x538] sm:$0xff] }
  0x6a   :  { %515 = vmatmul.f32.vlgmr.msrb.gmra.mxu2 %v1039_v61  ;;  %551 = vmatpush.msra.mxu0 %v172_v54  ;;  %v80_v54 = vld [vmem:[#allocation2 + $0x70] sm:$0xff] }
  0x6b   :  { %570 = vmatpush.msra.mxu1 %v223_v55  ;;  %591 = vmatpush.msra.mxu2 %v268_v57  ;;  %v131_v55 = vld [vmem:[#allocation2 + $0x208] sm:$0xff] }
  0x6c   :  { %610 = vmatpush.msra.mxu3 %v319_v58  ;;  %552 = vmatpush.msra.mxu0 %v169_v59  ;;  %v179_v57 = vld [vmem:[#allocation2 + $0x388] sm:$0xff]  ;;  %v230_v58 = vld [vmem:[#allocation2 + $0x520] sm:$0xff]  ;;  %v77_v59 = vld [vmem:[#allocation2 + $0x58] sm:$0xff] }
  0x6d   :  { %535 = vmatmul.f32.vlgmr.msrb.gmra.mxu3 %v1045_v3  ;;  %571 = vmatpush.msra.mxu1 %v220_v60  ;;  %v128_v60 = vld [vmem:[#allocation2 + $0x1f0] sm:$0xff] }
  0x6e   :  { %592 = vmatpush.msra.mxu2 %v265_v63  ;;  %611 = vmatpush.msra.mxu3 %v316_v0  ;;  %v176_v63 = vld [vmem:[#allocation2 + $0x370] sm:$0xff]  ;;  %v227_v0 = vld [vmem:[#allocation2 + $0x508] sm:$0xff] }
  0x6f   :  { %553 = vmatpush.msra.mxu0 %v166_v1  ;;  %572 = vmatpush.msra.mxu1 %v217_v2  ;;  %v74_v1 = vld [vmem:[#allocation2 + $0x40] sm:$0xff]  ;;  %v125_v2 = vld [vmem:[#allocation2 + $0x1d8] sm:$0xff] }
  0x70   :  { %593 = vmatpush.msra.mxu2 %v262_v4  ;;  %612 = vmatpush.msra.mxu3 %v313_v5  ;;  %v173_v4 = vld [vmem:[#allocation2 + $0x358] sm:$0xff]  ;;  %v224_v5 = vld [vmem:[#allocation2 + $0x4f0] sm:$0xff] }
  0x71   :  { %554 = vmatpush.msra.mxu0 %v163_v6  ;;  %573 = vmatpush.msra.mxu1 %v214_v7  ;;  %v71_v6 = vld [vmem:[#allocation2 + $0x28] sm:$0xff]  ;;  %v122_v7 = vld [vmem:[#allocation2 + $0x1c0] sm:$0xff] }
  0x72   :  { %594 = vmatpush.msra.mxu2 %v259_v8  ;;  %613 = vmatpush.msra.mxu3 %v310_v9  ;;  %v170_v8 = vld [vmem:[#allocation2 + $0x340] sm:$0xff]  ;;  %v221_v9 = vld [vmem:[#allocation2 + $0x4d8] sm:$0xff] }
  0x73   :  { %595 = vmatmul.f32.vlgmr.msra.gmra.mxu2 %v1049_v16  ;;  %619 = vmatpush.msrb.mxu0 %v113_v10  ;;  %v68_v10 = vld [vmem:[#allocation2 + $0x10] sm:$0xff] }
  0x74   :  { %574 = vmatpush.msra.mxu1 %v211_v11  ;;  %614 = vmatpush.msra.mxu3 %v307_v12  ;;  %v119_v11 = vld [vmem:[#allocation2 + $0x1a8] sm:$0xff]  ;;  %v305_v12 = vld [vmem:[#allocation2 + $0x778] sm:$0xff] }
  0x75   :  { %555 = vmatmul.f32.vlgmr.msra.gmra.mxu0 %v1037_v56  ;;  %615 = vmatmul.f32.vlgmr.msra.gmra.mxu3 %v1051_v21 }
  0x76   :  { %620 = vmatpush.msrb.mxu0 %v110_v13  ;;  %639 = vmatpush.msrb.mxu1 %v161_v14  ;;  %v167_v13 = vld [vmem:[#allocation2 + $0x328] sm:$0xff]  ;;  %v116_v14 = vld [vmem:[#allocation2 + $0x190] sm:$0xff] }
  0x77   :  { %575 = vmatmul.f32.vlgmr.msra.gmra.mxu1 %v1042_v62  ;;  %659 = vmatpush.msrb.mxu2 %v209_v15  ;;  %v218_v15 = vld [vmem:[#allocation2 + $0x4c0] sm:$0xff] }
  0x78   :  { %621 = vmatpush.msrb.mxu0 %v107_v17  ;;  %640 = vmatpush.msrb.mxu1 %v158_v18  ;;  %v302_v17 = vld [vmem:[#allocation2 + $0x760] sm:$0xff]  ;;  %v353_v18 = vld [vmem:[#allocation2 + $0x8f8] sm:$0xff] }
  0x79   :  { %660 = vmatpush.msrb.mxu2 %v206_v19  ;;  %679 = vmatpush.msrb.mxu3 %v257_v20  ;;  %v164_v19 = vld [vmem:[#allocation2 + $0x310] sm:$0xff]  ;;  %v215_v20 = vld [vmem:[#allocation2 + $0x4a8] sm:$0xff] }
  0x7a   :  { %622 = vmatpush.msrb.mxu0 %v104_v22  ;;  %641 = vmatpush.msrb.mxu1 %v155_v23  ;;  %v299_v22 = vld [vmem:[#allocation2 + $0x748] sm:$0xff]  ;;  %v350_v23 = vld [vmem:[#allocation2 + $0x8e0] sm:$0xff] }
  0x7b   :  { %661 = vmatpush.msrb.mxu2 %v203_v24  ;;  %680 = vmatpush.msrb.mxu3 %v254_v25  ;;  %v212_v24 = vld [vmem:[#allocation2 + $0x490] sm:$0xff] }
  0x7c   :  { %623 = vmatpush.msrb.mxu0 %v101_v26  ;;  %642 = vmatpush.msrb.mxu1 %v152_v27  ;;  %v296_v25 = vld [vmem:[#allocation2 + $0x730] sm:$0xff]  ;;  %v347_v26 = vld [vmem:[#allocation2 + $0x8c8] sm:$0xff]  ;;  %v293_v27 = vld [vmem:[#allocation2 + $0x718] sm:$0xff] }
  0x7d   :  { %662 = vmatpush.msrb.mxu2 %v200_v28  ;;  %681 = vmatpush.msrb.mxu3 %v251_v29  ;;  %v344_v28 = vld [vmem:[#allocation2 + $0x8b0] sm:$0xff] }
  0x7e   :  { %624 = vmatpush.msrb.mxu0 %v98_v30  ;;  %643 = vmatpush.msrb.mxu1 %v149_v31  ;;  %v760_v29 = vld [vmem:[%s1222_s3 + $0x78] sm:$0xff]  ;;  %v290_v30 = vld [vmem:[#allocation2 + $0x700] sm:$0xff]  ;;  %v341_v31 = vld [vmem:[#allocation2 + $0x898] sm:$0xff] }
  0x7f   :  { %663 = vmatpush.msrb.mxu2 %v197_v32  ;;  %682 = vmatpush.msrb.mxu3 %v248_v33  ;;  %v759_v32 = vld [vmem:[%s1222_s3 + $0x70] sm:$0xff]  ;;  %v338_v33 = vld [vmem:[#allocation2 + $0x880] sm:$0xff] }
  0x80   :  { %625 = vmatpush.msrb.mxu0 %v95_v34  ;;  %644 = vmatpush.msrb.mxu1 %v146_v35  ;;  %v758_v34 = vld [vmem:[%s1222_s3 + $0x68] sm:$0xff]  ;;  %v335_v35 = vld [vmem:[#allocation2 + $0x868] sm:$0xff] }
  0x81   :  { %664 = vmatpush.msrb.mxu2 %v194_v36  ;;  %683 = vmatpush.msrb.mxu3 %v245_v37  ;;  %v281_v36 = vld [vmem:[#allocation2 + $0x6b8] sm:$0xff]  ;;  %v332_v37 = vld [vmem:[#allocation2 + $0x850] sm:$0xff] }
  0x82   :  { %626 = vmatpush.msrb.mxu0 %v92_v38  ;;  %645 = vmatpush.msrb.mxu1 %v143_v39  ;;  %v278_v38 = vld [vmem:[#allocation2 + $0x6a0] sm:$0xff]  ;;  %v329_v39 = vld [vmem:[#allocation2 + $0x838] sm:$0xff] }
  0x83   :  { %665 = vmatpush.msrb.mxu2 %v191_v40  ;;  %684 = vmatpush.msrb.mxu3 %v242_v41  ;;  %v755_v40 = vld [vmem:[%s1222_s3 + $0x50] sm:$0xff] }
  0x84   :  { %627 = vmatpush.msrb.mxu0 %v89_v42  ;;  %646 = vmatpush.msrb.mxu1 %v140_v43  ;;  %v275_v41 = vld [vmem:[#allocation2 + $0x688] sm:$0xff]  ;;  %v326_v42 = vld [vmem:[#allocation2 + $0x820] sm:$0xff] }
  0x85   :  { %666 = vmatpush.msrb.mxu2 %v188_v44  ;;  %685 = vmatpush.msrb.mxu3 %v239_v45  ;;  %v754_v43 = vld [vmem:[%s1222_s3 + $0x48] sm:$0xff]  ;;  %v272_v44 = vld [vmem:[#allocation2 + $0x670] sm:$0xff]  ;;  %v323_v45 = vld [vmem:[#allocation2 + $0x808] sm:$0xff] }
  0x86   :  { %628 = vmatpush.msrb.mxu0 %v86_v46  ;;  %647 = vmatpush.msrb.mxu1 %v137_v47  ;;  %v269_v46 = vld [vmem:[#allocation2 + $0x658] sm:$0xff]  ;;  %v320_v47 = vld [vmem:[#allocation2 + $0x7f0] sm:$0xff] }
  0x87   :  { %667 = vmatpush.msrb.mxu2 %v185_v48  ;;  %686 = vmatpush.msrb.mxu3 %v236_v49  ;;  %v266_v48 = vld [vmem:[#allocation2 + $0x640] sm:$0xff]  ;;  %v317_v49 = vld [vmem:[#allocation2 + $0x7d8] sm:$0xff] }
  0x88   :  { %629 = vmatpush.msrb.mxu0 %v83_v50  ;;  %648 = vmatpush.msrb.mxu1 %v134_v51  ;;  %v753_v50 = vld [vmem:[%s1222_s3 + $0x40] sm:$0xff]  ;;  %v263_v51 = vld [vmem:[#allocation2 + $0x628] sm:$0xff] }
  0x89   :  { %668 = vmatpush.msrb.mxu2 %v182_v52  ;;  %687 = vmatpush.msrb.mxu3 %v233_v53  ;;  %v314_v52 = vld [vmem:[#allocation2 + $0x7c0] sm:$0xff]  ;;  %v260_v53 = vld [vmem:[#allocation2 + $0x610] sm:$0xff] }
  0x8a   :  { %630 = vmatpush.msrb.mxu0 %v80_v54  ;;  %649 = vmatpush.msrb.mxu1 %v131_v55  ;;  %v311_v54 = vld [vmem:[#allocation2 + $0x7a8] sm:$0xff]  ;;  %v752_v55 = vld [vmem:[%s1222_s3 + $0x38] sm:$0xff] }
  0x8b   :  { %669 = vmatpush.msrb.mxu2 %v179_v57  ;;  %688 = vmatpush.msrb.mxu3 %v230_v58  ;;  %v308_v57 = vld [vmem:[#allocation2 + $0x790] sm:$0xff]  ;;  %v751_v58 = vld [vmem:[%s1222_s3 + $0x30] sm:$0xff] }
  0x8c   :  { %631 = vmatpush.msrb.mxu0 %v77_v59  ;;  %650 = vmatpush.msrb.mxu1 %v128_v60  ;;  %v750_v59 = vld [vmem:[%s1222_s3 + $0x28] sm:$0xff]  ;;  %v749_v60 = vld [vmem:[%s1222_s3 + $0x20] sm:$0xff] }
  0x8d   :  { %670 = vmatpush.msrb.mxu2 %v176_v63  ;;  %689 = vmatpush.msrb.mxu3 %v227_v0  ;;  %v748_v63 = vld [vmem:[%s1222_s3 + $0x18] sm:$0xff]  ;;  %v746_v0 = vld [vmem:[%s1222_s3 + $0x8] sm:$0xff] }
  0x8e   :  { %632 = vmatpush.msrb.mxu0 %v74_v1  ;;  %651 = vmatpush.msrb.mxu1 %v125_v2  ;;  %v776_v1 = vld [vmem:[%s1222_s3 + $0xf8] sm:$0xff]  ;;  %v775_v2 = vld [vmem:[%s1222_s3 + $0xf0] sm:$0xff] }
  0x8f   :  { %671 = vmatpush.msrb.mxu2 %v173_v4  ;;  %690 = vmatpush.msrb.mxu3 %v224_v5  ;;  %v774_v4 = vld [vmem:[%s1222_s3 + $0xe8] sm:$0xff]  ;;  %v773_v5 = vld [vmem:[%s1222_s3 + $0xe0] sm:$0xff] }
  0x90   :  { %633 = vmatpush.msrb.mxu0 %v71_v6  ;;  %652 = vmatpush.msrb.mxu1 %v122_v7  ;;  %v772_v6 = vld [vmem:[%s1222_s3 + $0xd8] sm:$0xff]  ;;  %v1130_v7 = vld [vmem:[#allocation5] sm:$0x7] }
  0x91   :  { %672 = vmatpush.msrb.mxu2 %v170_v8  ;;  %691 = vmatpush.msrb.mxu3 %v221_v9  ;;  %v771_v8 = vld [vmem:[%s1222_s3 + $0xd0] sm:$0xff]  ;;  %v356_v9 = vperm.slane %v1130_v7, 0 }
  0x92   :  { %634 = vmatpush.msrb.mxu0 %v68_v10  ;;  %653 = vmatpush.msrb.mxu1 %v119_v11  ;;  %v770_v10 = vld [vmem:[%s1222_s3 + $0xc8] sm:$0xff] }
  0x93   :  { %673 = vmatpush.msrb.mxu2 %v167_v13  ;;  %692 = vmatpush.msrb.mxu3 %v218_v15 }
  0x94   :  { %699 = vmatpush.msra.mxu0 %v305_v12  ;;  %654 = vmatpush.msrb.mxu1 %v116_v14 }
  0x95   :  { %674 = vmatpush.msrb.mxu2 %v164_v19  ;;  %693 = vmatpush.msrb.mxu3 %v215_v20  ;;  %v768_v19 = vld [vmem:[%s1222_s3 + $0xb8] sm:$0xff] }
  0x96   :  { %700 = vmatpush.msra.mxu0 %v302_v17  ;;  %719 = vmatpush.msra.mxu1 %v353_v18  ;;  %v769_v17 = vld [vmem:[%s1222_s3 + $0xc0] sm:$0xff] }
  0x97   :  { %675 = vmatmul.f32.vlgmr.msrb.gmra.mxu2 %v1037_v56  ;;  %694 = vmatpush.msrb.mxu3 %v212_v24  ;;  %v287_v56 = vld [vmem:[#allocation2 + $0x6e8] sm:$0xff] }
  0x98   :  { %701 = vmatpush.msra.mxu0 %v299_v22  ;;  %720 = vmatpush.msra.mxu1 %v350_v23  ;;  %v767_v23 = vld [vmem:[%s1222_s3 + $0xb0] sm:$0xff] }
  0x99   :  { %635 = vmatmul.f32.vlgmr.msrb.gmra.mxu0 %v1039_v61  ;;  %695 = vmatmul.f32.vlgmr.msrb.gmra.mxu3 %v1042_v62  ;;  %v284_v61 = vld [vmem:[#allocation2 + $0x6d0] sm:$0xff]  ;;  %v757_v62 = vld [vmem:[%s1222_s3 + $0x60] sm:$0xff] }
  0x9a   :  { %702 = vmatpush.msra.mxu0 %v296_v25  ;;  %721 = vmatpush.msra.mxu1 %v347_v26  ;;  %v766_v25 = vld [vmem:[%s1222_s3 + $0xa8] sm:$0xff] }
  0x9b   :  { %655 = vmatmul.f32.vlgmr.msrb.gmra.mxu1 %v1045_v3  ;;  %797 = vmatpush.msra.mxu2 %v760_v29  ;;  %v756_v3 = vld [vmem:[%s1222_s3 + $0x58] sm:$0xff] }
  0x9c   :  { %703 = vmatpush.msra.mxu0 %v293_v27  ;;  %722 = vmatpush.msra.mxu1 %v344_v28  ;;  %v765_v28 = vld [vmem:[%s1222_s3 + $0xa0] sm:$0xff] }
  0x9d   :  { %798 = vmatpush.msra.mxu2 %v759_v32  ;;  %817 = vmatpush.msra.mxu3 %v776_v1  ;;  %v763_v32 = vld [vmem:[%s1222_s3 + $0x90] sm:$0xff] }
  0x9e   :  { %704 = vmatpush.msra.mxu0 %v290_v30  ;;  %723 = vmatpush.msra.mxu1 %v341_v31  ;;  %v764_v30 = vld [vmem:[%s1222_s3 + $0x98] sm:$0xff] }
  0x9f   :  { %799 = vmatpush.msra.mxu2 %v758_v34  ;;  %818 = vmatpush.msra.mxu3 %v775_v2  ;;  %v761_v34 = vld [vmem:[%s1222_s3 + $0x80] sm:$0xff] }
  0xa0   :  { %705 = vmatpush.msra.mxu0 %v287_v56  ;;  %724 = vmatpush.msra.mxu1 %v338_v33  ;;  %v762_v33 = vld [vmem:[%s1222_s3 + $0x88] sm:$0xff] }
  0xa1   :  { %800 = vmatpush.msra.mxu2 %v757_v62  ;;  %819 = vmatpush.msra.mxu3 %v774_v4  ;;  %v790_v62 = vld [vmem:[%s1222_s3 + $0x168] sm:$0xff] }
  0xa2   :  { %706 = vmatpush.msra.mxu0 %v284_v61  ;;  %725 = vmatpush.msra.mxu1 %v335_v35  ;;  %v792_v61 = vld [vmem:[%s1222_s3 + $0x178] sm:$0xff]  ;;  %v791_v35 = vld [vmem:[%s1222_s3 + $0x170] sm:$0xff] }
  0xa3   :  { %801 = vmatpush.msra.mxu2 %v756_v3  ;;  %820 = vmatpush.msra.mxu3 %v773_v5  ;;  %v787_v3 = vld [vmem:[%s1222_s3 + $0x150] sm:$0xff] }
  0xa4   :  { %707 = vmatpush.msra.mxu0 %v281_v36  ;;  %726 = vmatpush.msra.mxu1 %v332_v37  ;;  %v789_v36 = vld [vmem:[%s1222_s3 + $0x160] sm:$0xff]  ;;  %v788_v37 = vld [vmem:[%s1222_s3 + $0x158] sm:$0xff] }
  0xa5   :  { %802 = vmatpush.msra.mxu2 %v755_v40  ;;  %821 = vmatpush.msra.mxu3 %v772_v6 }
  0xa6   :  { %708 = vmatpush.msra.mxu0 %v278_v38  ;;  %727 = vmatpush.msra.mxu1 %v329_v39  ;;  %v786_v38 = vld [vmem:[%s1222_s3 + $0x148] sm:$0xff]  ;;  %v357_v39 = vperm.slane %v1130_v7, 1 }
  0xa7   :  { %803 = vmatpush.msra.mxu2 %v754_v43  ;;  %822 = vmatpush.msra.mxu3 %v771_v8 }
  0xa8   :  { %709 = vmatpush.msra.mxu0 %v275_v41  ;;  %728 = vmatpush.msra.mxu1 %v326_v42 }
  0xa9   :  { %804 = vmatpush.msra.mxu2 %v753_v50  ;;  %823 = vmatpush.msra.mxu3 %v770_v10 }
  0xaa   :  { %710 = vmatpush.msra.mxu0 %v272_v44  ;;  %729 = vmatpush.msra.mxu1 %v323_v45 }
  0xab   :  { %805 = vmatpush.msra.mxu2 %v752_v55  ;;  %824 = vmatpush.msra.mxu3 %v769_v17  ;;  %v783_v55 = vld [vmem:[%s1222_s3 + $0x130] sm:$0xff] }
  0xac   :  { %711 = vmatpush.msra.mxu0 %v269_v46  ;;  %730 = vmatpush.msra.mxu1 %v320_v47 }
  0xad   :  { %806 = vmatpush.msra.mxu2 %v751_v58  ;;  %825 = vmatpush.msra.mxu3 %v768_v19  ;;  %v782_v58 = vld [vmem:[%s1222_s3 + $0x128] sm:$0xff] }
  0xae   :  { %712 = vmatpush.msra.mxu0 %v266_v48  ;;  %731 = vmatpush.msra.mxu1 %v317_v49 }
  0xaf   :  { %807 = vmatpush.msra.mxu2 %v750_v59  ;;  %826 = vmatpush.msra.mxu3 %v767_v23  ;;  %v781_v59 = vld [vmem:[%s1222_s3 + $0x120] sm:$0xff] }
  0xb0   :  { %713 = vmatpush.msra.mxu0 %v263_v51  ;;  %732 = vmatpush.msra.mxu1 %v314_v52  ;;  %v785_v51 = vld [vmem:[%s1222_s3 + $0x140] sm:$0xff] }
  0xb1   :  { %808 = vmatpush.msra.mxu2 %v749_v60  ;;  %827 = vmatpush.msra.mxu3 %v766_v25  ;;  %v780_v60 = vld [vmem:[%s1222_s3 + $0x118] sm:$0xff] }
  0xb2   :  { %714 = vmatpush.msra.mxu0 %v260_v53  ;;  %733 = vmatpush.msra.mxu1 %v311_v54  ;;  %v784_v53 = vld [vmem:[%s1222_s3 + $0x138] sm:$0xff] }
  0xb3   :  { %715 = vmatmul.f32.vlgmr.msra.gmra.mxu0 %v1049_v16  ;;  %809 = vmatpush.msra.mxu2 %v748_v63  ;;  %v747_v16 = vld [vmem:[%s1222_s3 + $0x10] sm:$0xff] }
  0xb4   :  { %734 = vmatpush.msra.mxu1 %v308_v57  ;;  %828 = vmatpush.msra.mxu3 %v765_v28  ;;  %v779_v63 = vld [vmem:[%s1222_s3 + $0x110] sm:$0xff] }
  0xb5   :  { %735 = vmatmul.f32.vlgmr.msra.gmra.mxu1 %v1051_v21  ;;  %810 = vmatpush.msra.mxu2 %v747_v16  ;;  %v745_v21 = vld [vmem:[%s1222_s3] sm:$0xff]  ;;  %v778_v16 = vld [vmem:[%s1222_s3 + $0x108] sm:$0xff] }
  0xb6   :  { %829 = vmatpush.msra.mxu3 %v764_v30  ;;  %837 = vmatpush.msrb.mxu0 %v792_v61 }
  0xb7   :  { %811 = vmatpush.msra.mxu2 %v746_v0  ;;  %v777_v0 = vld [vmem:[%s1222_s3 + $0x100] sm:$0xff]  ;;  %s991_s3 = smov [#allocation8]  }
  0xb8   :  { %830 = vmatpush.msra.mxu3 %v763_v32  ;;  %838 = vmatpush.msrb.mxu0 %v791_v35  ;;  %s864_s19 = sshll.u32 %s991_s3, 4  ;;  %s865_s19 = int_to_ptr.vmem [resolvable:$true] %s864_s19 }
  0xb9   :  { %812 = vmatpush.msra.mxu2 %v745_v21  ;;  %v358_v21 = vperm.slane %v1130_v7, 2 }
  0xba   :  { %831 = vmatpush.msra.mxu3 %v762_v33  ;;  %839 = vmatpush.msrb.mxu0 %v790_v62 }
  0xbc   :  { %832 = vmatpush.msra.mxu3 %v761_v34  ;;  %840 = vmatpush.msrb.mxu0 %v789_v36 }
  0xbe   :  { %841 = vmatpush.msrb.mxu0 %v788_v37 }
  0xc0   :  { %842 = vmatpush.msrb.mxu0 %v787_v3 }
  0xc2   :  { %843 = vmatpush.msrb.mxu0 %v786_v38 }
  0xc4   :  { %844 = vmatpush.msrb.mxu0 %v785_v51 }
  0xc6   :  { %845 = vmatpush.msrb.mxu0 %v784_v53 }
  0xc8   :  { %846 = vmatpush.msrb.mxu0 %v783_v55 }
  0xca   :  { %v396_v11 = vpop.f32.mrf.mxu0  ;;  %847 = vmatpush.msrb.mxu0 %v782_v58 }
  0xcb   :  { %v397_v12 = vadd.f32 %v396_v11, %v356_v9 }
  0xcc   :  { %848 = vmatpush.msrb.mxu0 %v781_v59 }
  0xcd   :  { %v416_v13 = vpop.f32.mrf.mxu1 }
  0xce   :  { %v417_v14 = vadd.f32 %v416_v13, %v397_v12  ;;  %v436_v15 = vpop.f32.mrf.mxu2  ;;  %849 = vmatpush.msrb.mxu0 %v780_v60 }
  0xd0   :  { %v437_v18 = vadd.f32 %v436_v15, %v417_v14  ;;  %850 = vmatpush.msrb.mxu0 %v779_v63 }
  0xd1   :  { %v456_v20 = vpop.f32.mrf.mxu3 }
  0xd2   :  { %v457_v22 = vadd.f32 %v456_v20, %v437_v18  ;;  %851 = vmatpush.msrb.mxu0 %v778_v16  ;;  %v883_v18 = vld [vmem:[#allocation7] ss:$0 sm:$0xff] }
  0xd4   :  { %v476_v24 = vpop.f32.mrf.mxu0  ;;  %852 = vmatpush.msrb.mxu0 %v777_v0 }
  0xd5   :  { %v477_v26 = vadd.f32 %v476_v24, %v457_v22 }
  0xd6   :  { %v496_v27 = vpop.f32.mrf.mxu1 }
  0xd7   :  { %v497_v29 = vadd.f32 %v496_v27, %v477_v26 }
  0xd9   :  { %v739_v31 = vmul.f32 0.01, %v497_v29 }
  0xdb   :  { %v742_v56 = vmax.f32 %v497_v29, %v739_v31 }
  0xdd   :  { %813 = vmatmul.f32.vlgmr.msra.gmra.mxu2 %v742_v56 }
  0xed   :  { %v516_v40 = vpop.f32.mrf.mxu2 }
  0xee   :  { %v517_v41 = vadd.f32 %v516_v40, %v357_v39 }
  0xf0   :  { %v536_v42 = vpop.f32.mrf.mxu3 }
  0xf1   :  { %v537_v43 = vadd.f32 %v536_v42, %v517_v41 }
  0xf2   :  { %v556_v44 = vpop.f32.mrf.mxu0 }
  0xf3   :  { %v557_v45 = vadd.f32 %v556_v44, %v537_v43 }
  0xf4   :  { %v576_v46 = vpop.f32.mrf.mxu1 }
  0xf5   :  { %v577_v47 = vadd.f32 %v576_v46, %v557_v45 }
  0xf6   :  { %v596_v48 = vpop.f32.mrf.mxu2 }
  0xf7   :  { %v597_v49 = vadd.f32 %v596_v48, %v577_v47 }
  0xf8   :  { %v616_v50 = vpop.f32.mrf.mxu3 }
  0xf9   :  { %v617_v52 = vadd.f32 %v616_v50, %v597_v49 }
  0xfb   :  { %v740_v54 = vmul.f32 0.01, %v617_v52 }
  0xfd   :  { %v743_v57 = vmax.f32 %v617_v52, %v740_v54 }
  0xff   :  { %833 = vmatmul.f32.vlgmr.msra.gmra.mxu3 %v743_v57 }
 0x116   :  { %v636_v1 = vpop.f32.mrf.mxu0 }
 0x117   :  { %v637_v2 = vadd.f32 %v636_v1, %v358_v21 }
 0x118   :  { %v656_v4 = vpop.f32.mrf.mxu1 }
 0x119   :  { %v657_v5 = vadd.f32 %v656_v4, %v637_v2 }
 0x11a   :  { %v676_v6 = vpop.f32.mrf.mxu2 }
 0x11b   :  { %v677_v8 = vadd.f32 %v676_v6, %v657_v5 }
 0x11c   :  { %v696_v9 = vpop.f32.mrf.mxu3 }
 0x11d   :  { %v697_v10 = vadd.f32 %v696_v9, %v677_v8 }
 0x130   :  { %v716_v11 = vpop.f32.mrf.mxu0 }
 0x131   :  { %v717_v12 = vadd.f32 %v716_v11, %v697_v10 }
 0x132   :  { %v736_v13 = vpop.f32.mrf.mxu1 }
 0x133   :  { %v737_v14 = vadd.f32 %v736_v13, %v717_v12 }
 0x135   :  { %v741_v15 = vmul.f32 0.01, %v737_v14 }
 0x137   :  { %v744_v17 = vmax.f32 %v737_v14, %v741_v15 }
 0x139   :  { %853 = vmatmul.f32.vlgmr.msrb.gmra.mxu0 %v744_v17 }
 0x160   :  { %v814_v19 = vpop.f32.mrf.mxu2 }
 0x161   :  { %v815_v22 = vadd.f32 %v883_v18, %v814_v19 }
 0x182   :  { %v834_v20 = vpop.f32.mrf.mxu3 }
 0x183   :  { %v835_v7 = vadd.f32 %v834_v20, %v815_v22 }
 0x1b6   :  { %v854_v23 = vpop.f32.mrf.mxu0 }
 0x1b7   :  { %v855_v24 = vadd.f32 %v854_v23, %v835_v7 }
 0x1b9   :  { %858 = vst.msk [vmem:[#allocation8] sm:$0x3] %vm857_vm0, %v855_v24 }
 0x1ba   :  { %869 = dma.vmem_to_hbm [thread:$0]  %s865_s19, 32, %s867_s22, [#allocation4]  }
 0x1bb   :  { %984 = dma.done.wait [#allocation4], 32  }
 0x1bc   :  { %985 = vsyncadd [#allocation4], 4294967264 }
 0x1bd   :  { %874 = vsyncpa [#allocation3], 1 }
 0x1be   :  { %875 = vsyncpa [#allocation6], 1 }
 0x1bf   :  { %876 = vsyncpa [#allocation4], 1 }

</bundles_post_ra>
